<compile_context>
chip_gen: v7x
topology: tpu7x:2x2x1
jax: 0.10.0
libtpu: 0.0.40
codegen_flags: <defaults>
</compile_context>

<pallas_src>
import functools

import jax
import jax.numpy as jnp
from jax.experimental import pallas as pl
from jax.experimental.pallas import tpu as pltpu


def _round_up(n, m):
    return ((n + m - 1) // m) * m


# ------------------------------ Pallas kernel ------------------------------ #

def _fused_kernel(patches_ref, wconv_ref, wcls_ref, bcls_ref, out_ref,
                  pooled_acc, *, hw):
    """Fused conv3x3 (im2col matmul) + ReLU + global avg pool + Linear.

    Grid = (B, R): batch outer ("parallel"), spatial row-tiles inner ("arbitrary").

    patches_ref: (TILE_ROWS, K_pad)  bf16  im2col patches for this row tile
    wconv_ref:   (K_pad,  C_pad)     bf16  flattened 3x3 conv weight
    wcls_ref:    (C_pad,  N_pad)     f32   classifier weight (transposed)
    bcls_ref:    (1, N_pad)          f32   classifier bias
    out_ref:     (1, N_pad)          f32   logits for this batch element
    pooled_acc:  (1, C_pad)          f32   VMEM scratch: running spatial sum
    """
    r = pl.program_id(1)

    @pl.when(r == 0)
    def _init():
        pooled_acc[...] = jnp.zeros_like(pooled_acc)

    # One lane-dense MXU matmul per tile: (TILE_ROWS, K_pad) @ (K_pad, C_pad).
    conv = jnp.dot(patches_ref[...], wconv_ref[...],
                   preferred_element_type=jnp.float32)
    feat = jnp.maximum(conv, 0.0)                               # ReLU
    pooled_acc[...] += jnp.sum(feat, axis=0, keepdims=True)     # spatial sum

    @pl.when(r == pl.num_programs(1) - 1)
    def _finalize():
        pooled = pooled_acc[...] * (1.0 / hw)                   # avg pool
        logits = jnp.dot(pooled, wcls_ref[...],
                         preferred_element_type=jnp.float32) + bcls_ref[...]
        out_ref[...] = logits.astype(out_ref.dtype)


# --------------------------------- Wrapper --------------------------------- #

def init_params(key, in_ch, feat_dim, n_classes):
    k1, k2, k3 = jax.random.split(key, 3)
    # conv stand-in weights (deterministic, He-ish scale)
    w_conv = jax.random.normal(k1, (3, 3, in_ch, feat_dim), jnp.float32) * (
        2.0 / (9 * in_ch)) ** 0.5
    # nn.Linear(feat_dim, n_classes): weight (n_classes, feat_dim), bias (1, n_classes)
    w_cls = jax.random.normal(k2, (n_classes, feat_dim), jnp.float32) * (
        1.0 / feat_dim) ** 0.5
    b_cls = jax.random.normal(k3, (1, n_classes), jnp.float32) * 0.01
    return w_conv, w_cls, b_cls


@jax.jit
def metric_net_forward(x_nchw, label, w_conv, w_cls, b_cls):
    del label  # softmax head: label is unused, matching the PyTorch forward
    B, Cin, H, W = x_nchw.shape
    feat_dim = w_conv.shape[-1]
    n_classes = w_cls.shape[0]
    HW = H * W
    K = 9 * Cin

    # Lane-dense padding targets (everything that lands on the lane axis -> x128).
    K_pad = _round_up(K, 128)
    C_pad = _round_up(feat_dim, 128)
    N_pad = _round_up(n_classes, 128)

    # Row tiling over the spatial axis (sublane axis of the matmul LHS).
    TILE_ROWS = 128 if HW % 128 == 0 else HW
    R = HW // TILE_ROWS

    # --- layout glue (plain JAX) --------------------------------------------
    # NCHW -> NHWC, zero-pad spatial borders, im2col the 9 taps along the
    # channel axis so the kernel sees one big lane-dense contraction
    # (K=9*Cin padded to 128) instead of nine tiny K=Cin matmuls and nine
    # unaligned in-kernel slices.
    x = jnp.transpose(x_nchw, (0, 2, 3, 1)).astype(jnp.float32)
    xp = jnp.pad(x, ((0, 0), (1, 1), (1, 1), (0, 0)))
    taps = [xp[:, dy:dy + H, dx:dx + W, :] for dy in range(3) for dx in range(3)]
    patches = jnp.concatenate(taps, axis=-1).reshape(B, HW, K)
    patches = jnp.pad(patches, ((0, 0), (0, 0), (0, K_pad - K)))
    patches = patches.astype(jnp.bfloat16)               # bf16 MXU operands

    w_flat = w_conv.reshape(K, feat_dim)                  # (dy, dx, cin) order
    w_flat = jnp.pad(w_flat, ((0, K_pad - K), (0, C_pad - feat_dim)))
    w_flat = w_flat.astype(jnp.bfloat16)

    w_cls_t = jnp.pad(w_cls.T.astype(jnp.float32),
                      ((0, C_pad - feat_dim), (0, N_pad - n_classes)))
    b_cls_p = jnp.pad(b_cls.astype(jnp.float32),
                      ((0, 0), (0, N_pad - n_classes)))

    kernel = functools.partial(_fused_kernel, hw=HW)

    out = pl.pallas_call(
        kernel,
        out_shape=jax.ShapeDtypeStruct((B, 1, N_pad), jnp.float32),
        grid=(B, R),
        in_specs=[
            pl.BlockSpec((None, TILE_ROWS, K_pad), lambda b, r: (b, r, 0)),
            pl.BlockSpec((K_pad, C_pad), lambda b, r: (0, 0)),
            pl.BlockSpec((C_pad, N_pad), lambda b, r: (0, 0)),
            pl.BlockSpec((1, N_pad), lambda b, r: (0, 0)),
        ],
        out_specs=pl.BlockSpec((None, 1, N_pad), lambda b, r: (b, 0, 0)),
        scratch_shapes=[pltpu.VMEM((1, C_pad), jnp.float32)],
        compiler_params=pltpu.CompilerParams(
            dimension_semantics=("parallel", "arbitrary"),
            vmem_limit_bytes=32 * 1024 * 1024,
        ),
    )(patches, w_flat, w_cls_t, b_cls_p)

    return out[:, 0, :n_classes]


# ------------------------------- Reference --------------------------------- #

def reference_forward(x_nchw, w_conv, w_cls, b_cls):
    """Pure-JAX reference (same bf16-operand / f32-accumulate math)."""
    x = jnp.transpose(x_nchw, (0, 2, 3, 1)).astype(jnp.float32)
    B, H, W, Cin = x.shape
    xp = jnp.pad(x, ((0, 0), (1, 1), (1, 1), (0, 0)))
    taps = [xp[:, dy:dy + H, dx:dx + W, :] for dy in range(3) for dx in range(3)]
    patches = jnp.concatenate(taps, axis=-1).reshape(B, H * W, 9 * Cin)
    conv = jnp.einsum(
        'bpk,kc->bpc',
        patches.astype(jnp.bfloat16),
        w_conv.reshape(9 * Cin, -1).astype(jnp.bfloat16),
        preferred_element_type=jnp.float32)
    feat = jnp.maximum(conv, 0.0)
    pooled = jnp.mean(feat, axis=1)
    return pooled @ w_cls.T + b_cls


if __name__ == "__main__":
    key = jax.random.PRNGKey(0)
    kx, kl, kp = jax.random.split(key, 3)

    B, Cin, H, W = 2, 4, 16, 16      # input images (NCHW, like PyTorch)
    feat_dim = 32                    # stand-in for efficientnet_b0 final_in_features
    n_classes = 16

    x = jax.random.normal(kx, (B, Cin, H, W), jnp.float32)
    label = jax.random.randint(kl, (B,), 0, n_classes)
    w_conv, w_cls, b_cls = init_params(kp, Cin, feat_dim, n_classes)

    logits = metric_net_forward(x, label, w_conv, w_cls, b_cls)
    logits = jax.block_until_ready(logits)

    ref = reference_forward(x, w_conv, w_cls, b_cls)
    assert logits.shape == (B, n_classes)
    assert jnp.allclose(logits, ref, rtol=1e-3, atol=1e-3), "mismatch vs reference"

    print("KERNEL_OK")
</pallas_src>

<mosaic_0001>
module attributes {stable_mosaic.version = 11 : i64} {
  func.func @_fused_kernel(%arg0: i32, %arg1: i32, %arg2: memref<1x128x128xbf16, #tpu.memory_space<vmem>>, %arg3: memref<128x128xbf16, #tpu.memory_space<vmem>>, %arg4: memref<128x128xf32, #tpu.memory_space<vmem>>, %arg5: memref<1x128xf32, #tpu.memory_space<vmem>>, %arg6: memref<1x1x128xf32, #tpu.memory_space<vmem>>, %arg7: memref<1x128xf32, #tpu.memory_space<vmem>>) attributes {dimension_semantics = [#tpu.dimension_semantics<parallel>, #tpu.dimension_semantics<arbitrary>], iteration_bounds = array<i64: 2, 2>, scalar_prefetch = 0 : i64, scratch_operands = 1 : i64, tpu.core_type = #tpu.core_type<tc>, window_params = [{transform_indices = @transform_0, window_bounds = array<i64: 1, 128, 128>}, {pipeline_mode = #tpu.pipeline_mode<synchronous>, transform_indices = @transform_1, window_bounds = array<i64: 128, 128>}, {pipeline_mode = #tpu.pipeline_mode<synchronous>, transform_indices = @transform_2, window_bounds = array<i64: 128, 128>}, {pipeline_mode = #tpu.pipeline_mode<synchronous>, transform_indices = @transform_3, window_bounds = array<i64: 1, 128>}, {transform_indices = @transform_4, window_bounds = array<i64: 1, 1, 128>}]} {
    %c0_i32 = arith.constant 0 : i32
    %0 = arith.cmpi eq, %arg1, %c0_i32 : i32
    %1 = arith.extui %0 : i1 to i32
    %c0_i32_0 = arith.constant 0 : i32
    %2 = arith.cmpi ne, %1, %c0_i32_0 : i32
    scf.if %2 {
      %cst_12 = arith.constant 0.000000e+00 : f32
      %17 = vector.broadcast %cst_12 : f32 to vector<1x128xf32>
      %c0_13 = arith.constant 0 : index
      %c0_14 = arith.constant 0 : index
      %18 = vector.load %arg7[%c0_13, %c0_14] : memref<1x128xf32, #tpu.memory_space<vmem>>, vector<1x128xf32>
      tpu.vector_store %arg7[%c0_13, %c0_14], %17 {strides = array<i32>} : memref<1x128xf32, #tpu.memory_space<vmem>>, vector<1x128xf32>,
    } else {
    }
    %c0 = arith.constant 0 : index
    %c0_1 = arith.constant 0 : index
    %c0_2 = arith.constant 0 : index
    %3 = vector.load %arg2[%c0, %c0_1, %c0_2] : memref<1x128x128xbf16, #tpu.memory_space<vmem>>, vector<1x128x128xbf16>
    %4 = vector.shape_cast %3 : vector<1x128x128xbf16> to vector<128x128xbf16>
    %c0_3 = arith.constant 0 : index
    %c0_4 = arith.constant 0 : index
    %5 = vector.load %arg3[%c0_3, %c0_4] : memref<128x128xbf16, #tpu.memory_space<vmem>>, vector<128x128xbf16>
    %cst = arith.constant dense<0.000000e+00> : vector<128x128xf32>
    %6 = tpu.matmul %4, %5, %cst {dimension_numbers = #tpu.dot_dimension_numbers<[1], [0], [0], [1], [0, 0, 1, 1], [], []>} : vector<128x128xbf16>, vector<128x128xbf16>, vector<128x128xf32> -> vector<128x128xf32>
    %cst_5 = arith.constant 0.000000e+00 : f32
    %7 = vector.broadcast %cst_5 : f32 to vector<128x128xf32>
    %8 = arith.maximumf %6, %7 : vector<128x128xf32>
    %c0_6 = arith.constant 0 : index
    %c0_7 = arith.constant 0 : index
    %9 = vector.load %arg7[%c0_6, %c0_7] : memref<1x128xf32, #tpu.memory_space<vmem>>, vector<1x128xf32>
    %cst_8 = arith.constant dense<0.000000e+00> : vector<128xf32>
    %10 = vector.multi_reduction <add>, %8, %cst_8 [0] : vector<128x128xf32> to vector<128xf32>
    %11 = vector.shape_cast %10 : vector<128xf32> to vector<1x128xf32>
    %12 = arith.addf %9, %11 : vector<1x128xf32>
    %c0_9 = arith.constant 0 : index
    %c0_10 = arith.constant 0 : index
    %13 = vector.load %arg7[%c0_9, %c0_10] : memref<1x128xf32, #tpu.memory_space<vmem>>, vector<1x128xf32>
    tpu.vector_store %arg7[%c0_9, %c0_10], %12 {strides = array<i32>} : memref<1x128xf32, #tpu.memory_space<vmem>>, vector<1x128xf32>,
    %c1_i32 = arith.constant 1 : i32
    %14 = arith.cmpi eq, %arg1, %c1_i32 : i32
    %15 = arith.extui %14 : i1 to i32
    %c0_i32_11 = arith.constant 0 : i32
    %16 = arith.cmpi ne, %15, %c0_i32_11 : i32
    scf.if %16 {
      %c0_12 = arith.constant 0 : index
      %c0_13 = arith.constant 0 : index
      %17 = vector.load %arg7[%c0_12, %c0_13] : memref<1x128xf32, #tpu.memory_space<vmem>>, vector<1x128xf32>
      %cst_14 = arith.constant 3.906250e-03 : f32
      %18 = vector.broadcast %cst_14 : f32 to vector<1x128xf32>
      %19 = arith.mulf %17, %18 : vector<1x128xf32>
      %c0_15 = arith.constant 0 : index
      %c0_16 = arith.constant 0 : index
      %20 = vector.load %arg4[%c0_15, %c0_16] : memref<128x128xf32, #tpu.memory_space<vmem>>, vector<128x128xf32>
      %cst_17 = arith.constant dense<0.000000e+00> : vector<1x128xf32>
      %21 = tpu.matmul %19, %20, %cst_17 {dimension_numbers = #tpu.dot_dimension_numbers<[1], [0], [0], [1], [0, 0, 1, 1], [], []>} : vector<1x128xf32>, vector<128x128xf32>, vector<1x128xf32> -> vector<1x128xf32>
      %c0_18 = arith.constant 0 : index
      %c0_19 = arith.constant 0 : index
      %22 = vector.load %arg5[%c0_18, %c0_19] : memref<1x128xf32, #tpu.memory_space<vmem>>, vector<1x128xf32>
      %23 = arith.addf %21, %22 : vector<1x128xf32>
      %c0_20 = arith.constant 0 : index
      %c0_21 = arith.constant 0 : index
      %c0_22 = arith.constant 0 : index
      %24 = vector.load %arg6[%c0_20, %c0_21, %c0_22] : memref<1x1x128xf32, #tpu.memory_space<vmem>>, vector<1x1x128xf32>
      %25 = vector.shape_cast %24 : vector<1x1x128xf32> to vector<1x128xf32>
      %26 = vector.shape_cast %23 : vector<1x128xf32> to vector<1x1x128xf32>
      tpu.vector_store %arg6[%c0_20, %c0_21, %c0_22], %26 {strides = array<i32>} : memref<1x1x128xf32, #tpu.memory_space<vmem>>, vector<1x1x128xf32>,
    } else {
    }
    return
  }
  func.func @transform_0(%arg0: i32, %arg1: i32) -> (i32, i32, i32) {
    %c0_i32 = arith.constant 0 : i32
    %c0_i32_0 = arith.constant 0 : i32
    return %arg0, %arg1, %c0_i32 : i32, i32, i32
  }
  func.func @transform_1(%arg0: i32, %arg1: i32) -> (i32, i32) {
    %c0_i32 = arith.constant 0 : i32
    %c0_i32_0 = arith.constant 0 : i32
    %c0_i32_1 = arith.constant 0 : i32
    return %c0_i32, %c0_i32_0 : i32, i32
  }
  func.func @transform_2(%arg0: i32, %arg1: i32) -> (i32, i32) {
    %c0_i32 = arith.constant 0 : i32
    %c0_i32_0 = arith.constant 0 : i32
    %c0_i32_1 = arith.constant 0 : i32
    return %c0_i32, %c0_i32_0 : i32, i32
  }
  func.func @transform_3(%arg0: i32, %arg1: i32) -> (i32, i32) {
    %c0_i32 = arith.constant 0 : i32
    %c0_i32_0 = arith.constant 0 : i32
    %c0_i32_1 = arith.constant 0 : i32
    return %c0_i32, %c0_i32_0 : i32, i32
  }
  func.func @transform_4(%arg0: i32, %arg1: i32) -> (i32, i32, i32) {
    %c0_i32 = arith.constant 0 : i32
    %c0_i32_0 = arith.constant 0 : i32
    %c0_i32_1 = arith.constant 0 : i32
    return %arg0, %c0_i32, %c0_i32_0 : i32, i32, i32
  }
}

</mosaic_0001>

<bundles_post_ra>
// kernel: metric_net_forward.1
= control target key start
LH: loop header
LB: loop body
LE: loop exit
PB: predicated region body
PF: predicated region fallthrough
CT: control target
= control target key end

     0   :  { %9 = vsyncpa [#allocation4], 0  ;;  %s1281_s0 = inlined_call_operand.vmem [shape: bf16[2,256,128], index: 0, kind: input, shape index: {}]   ;;  %s1282_s1 = inlined_call_operand.vmem [shape: bf16[128,128], index: 1, kind: input, shape index: {}]   ;;  %s1283_s2 = inlined_call_operand.vmem [shape: f32[128,128], index: 2, kind: input, shape index: {}]   ;;  %s1284_s3 = inlined_call_operand.vmem [shape: f32[1,128], index: 3, kind: input, shape index: {}]   ;;  %s1285_s4 = inlined_call_operand.hbm [shape: f32[2,1,128], index: 4, kind: output, shape index: {}]  }
   0x1   :  { %11 = vsyncpa [#allocation4 + $0x1], 0  ;;  %s1059_s15 = smov 0   ;;  %s1061_s16 = smov 0  }
   0x2   :  { %s1063_s17 = smov 0   ;;  %s1065_s18 = smov 0  }
   0x3   :  { %s1067_s19 = smov 0   ;;  %s1069_s20 = smov 0  }
   0x4   :  { %s1071_s21 = smov 0   ;;  %s1073_s22 = smov 0  }
   0x5 LB: > { %s673_s23 = sadd.s32 4294967295, %s1027_s22   ;;  %s674_s24 = sadd.s32 4294967294, %s1027_s22   ;;  %s1027_s22 = sphi %s1073_s22, %s17_s22   ;;  %s1023_s21 = sphi %s1071_s21, %s1294_s21   ;;  %s1019_s20 = sphi %s1069_s20, %s1293_s20   ;;  %s1015_s19 = sphi %s1067_s19, %s1292_s19   ;;  %s1011_s18 = sphi %s1065_s18, %s1291_s18   ;;  %s1007_s17 = sphi %s1063_s17, %s1290_s17   ;;  %s1003_s16 = sphi %s1061_s16, %s1289_s16   ;;  %s999_s15 = sphi %s1059_s15, %s1288_s15  }
   0x6   : > { %s26_s25 = sadd.s32 1, %s1019_s20  ;;  %s29_s26 = sadd.s32 1, %s1023_s21 }
   0x7   : > { %p27_p0 = scmp.ge.s32.totalorder %s26_s25, 2  ;;  %p137_p1 = scmp.ne.s32.totalorder %s1007_s17, %s1003_s16 }
   0x8   : > { %p138_p2 = scmp.eq.s32.totalorder %s673_s23, 3  ;;  %p143_p4 = scmp.ne.s32.totalorder %s1003_s16, %s999_s15 }
   0x9   : > { %s1296_s25 = smov (%p27_p0, %s26_s25), 0  ;;  %s1298_s26 = smov (!%p27_p0, %s29_s26), %s1023_s21 }
   0xa   : > { %p1108_p3 = por %p138_p2, %p137_p1  ;;  %p31_p5 = scmp.ge.s32.totalorder %s1298_s26, 2 }
   0xb   : > { %p144_p6 = scmp.eq.s32.totalorder %s674_s24, 3  ;;  %p677_p7 = scmp.ge.s32.totalorder %s1027_s22, 1 }
   0xc   : > { %p184_p8 = scmp.lt.s32.totalorder %s1027_s22, 5  ;;  %s1300_s26 = smov (%p31_p5, %s1298_s26), 0 }
   0xd   : > { %p1118_p9 = por %p144_p6, %p143_p4  ;;  %s124_s29 = ssub.s32 %s1023_s21, %s1300_s26 }
   0xe   : > { %p185_p10 = pnand %p677_p7, %p184_p8  ;;  %s127_s30 = sadd.s32 1, %s1007_s17 }
   0xf   : > { %p125_p11 = scmp.eq.s32.totalorder %s124_s29, 0  ;;  %s211_s6 = sand.u32 (!%p185_p10), 1, %s1003_s16  }
  0x10   : > { %188 = sbr.rel (%p185_p10) target bundleno = 574 (0x23e), region = 36  ;;  %s678_s7 = sshll.u32 (!%p185_p10), %s1011_s18, 4 }
  0x11   : > { %s1126_s5 = scalar_select %p125_p11, %s1007_s17, %s127_s30  }
  0x12   : > { %p214_p12 = scmp.lt.s32.totalorder (!%p185_p10), %s1015_s19, 1  ;;  %p216_p13 = scmp.lt.s32.totalorder (!%p185_p10), %s678_s7, 31 }
  0x13   : > { %s1139_s23 = scalar_lea.vmem (!%p185_p10), [#allocation3], %s211_s6  ;;  %p681_p0 = scmp.ne.s32.totalorder (!%p185_p10), %s1011_s18, 0 }
  0x17   : > { %s215_s8 = scalar_select %p214_p12, %s1015_s19, 1 }
  0x18   : > { %s1302_s7 = smov (!%p216_p13, %s678_s7), 31  ;;  %227 = sbr.rel (%p681_p0) target bundleno = 31 (0x1f), region = 40 }
  0x19   : > { %s679_s9 = sshll.u32 %s215_s8, 5  ;;  %v1029_v0 = vmov (!%p681_p0), 0.0  }
  0x1a   : > { %s219_s10 = sadd.s32 %s679_s9, %s1302_s7  ;;  %228 = vst [vmem:[#allocation2] sm:$0x1] (!%p681_p0), %v1029_v0 }
  0x1b   : > { %s680_s11 = sshll.u32 %s219_s10, 2 }
  0x1c   : > { %s1135_s14 = scalar_lea.vmem %s1281_s0, %s680_s11 }
  0x1f PF: > { %v917_v1 = vld [vmem:[%s1282_s1] sm:$0xff]   ;;  %v918_v2 = vld [vmem:[%s1282_s1 + $0x8] sm:$0xff]   ;;  %v919_v3 = vld [vmem:[%s1282_s1 + $0x10] sm:$0xff]   ;;  %p698_p1 = scmp.ne.s32.totalorder %s1011_s18, 1 }
  0x20   : > { %735 = vmatprep.subr.bf16.mxu0 %v917_v1  ;;  %826 = vmatprep.subr.bf16.mxu1 %v917_v1  ;;  %v920_v4 = vld [vmem:[%s1282_s1 + $0x18] sm:$0xff]   ;;  %v925_v5 = vld [vmem:[%s1135_s14] sm:$0xff]   ;;  %v922_v8 = vld [vmem:[%s1282_s1 + $0x28] sm:$0xff]   ;;  %vm1031_vm0 = vmmov (!%p698_p1), 0  }
  0x21   : > { %736 = vmatpush3.bf16.msra.mxu0 %v917_v1  ;;  %834 = vmatpush3.bf16.msra.mxu1 %v917_v1  ;;  %v921_v6 = vld [vmem:[%s1282_s1 + $0x20] sm:$0xff]   ;;  %v923_v9 = vld [vmem:[%s1282_s1 + $0x30] sm:$0xff]   ;;  %v924_v10 = vld [vmem:[%s1282_s1 + $0x38] sm:$0xff]  }
  0x22   : > { %737 = vmatprep.subr.bf16.mxu0 %v918_v2  ;;  %827 = vmatprep.subr.bf16.mxu1 %v918_v2  ;;  %v929_v7 = vld [vmem:[%s1135_s14 + $0x20] sm:$0xff]   ;;  %v926_v11 = vld [vmem:[%s1135_s14 + $0x8] sm:$0xff]   ;;  %v927_v13 = vld [vmem:[%s1135_s14 + $0x10] sm:$0xff]  }
  0x23   : > { %751 = vmatprep.mubr.bf16.mxu0 %v925_v5  ;;  %759 = vmatprep.mubr.bf16.mxu1 %v929_v7  ;;  %v930_v12 = vld [vmem:[%s1135_s14 + $0x28] sm:$0xff]   ;;  %v931_v14 = vld [vmem:[%s1135_s14 + $0x30] sm:$0xff]   ;;  %v928_v15 = vld [vmem:[%s1135_s14 + $0x18] sm:$0xff]  }
  0x24   : > { %v932_v16 = vld [vmem:[%s1135_s14 + $0x38] sm:$0xff]   ;;  %v470_v5 = vld [vmem:[#allocation2] sm:$0x1] }
  0x25   : > { %738 = vmatpush3.bf16.msra.mxu0 %v918_v2  ;;  %835 = vmatpush3.bf16.msra.mxu1 %v918_v2 }
  0x26   : > { %739 = vmatprep.subr.bf16.mxu0 %v919_v3  ;;  %828 = vmatprep.subr.bf16.mxu1 %v919_v3 }
  0x29   : > { %740 = vmatpush3.bf16.msra.mxu0 %v919_v3  ;;  %836 = vmatpush3.bf16.msra.mxu1 %v919_v3 }
  0x2a   : > { %741 = vmatprep.subr.bf16.mxu0 %v920_v4  ;;  %829 = vmatprep.subr.bf16.mxu1 %v920_v4 }
  0x2d   : > { %742 = vmatpush3.bf16.msra.mxu0 %v920_v4  ;;  %837 = vmatpush3.bf16.msra.mxu1 %v920_v4 }
  0x2e   : > { %743 = vmatprep.subr.bf16.mxu0 %v921_v6  ;;  %830 = vmatprep.subr.bf16.mxu1 %v921_v6 }
  0x31   : > { %744 = vmatpush3.bf16.msra.mxu0 %v921_v6  ;;  %838 = vmatpush3.bf16.msra.mxu1 %v921_v6 }
  0x32   : > { %745 = vmatprep.subr.bf16.mxu0 %v922_v8  ;;  %831 = vmatprep.subr.bf16.mxu1 %v922_v8 }
  0x35   : > { %746 = vmatpush3.bf16.msra.mxu0 %v922_v8  ;;  %839 = vmatpush3.bf16.msra.mxu1 %v922_v8  ;;  %v500_v8 = vld [vmem:[%s1283_s2] sm:$0xff] (!%p698_p1) }
  0x36   : > { %747 = vmatprep.subr.bf16.mxu0 %v923_v9  ;;  %832 = vmatprep.subr.bf16.mxu1 %v923_v9 }
  0x39   : > { %748 = vmatpush3.bf16.msra.mxu0 %v923_v9  ;;  %840 = vmatpush3.bf16.msra.mxu1 %v923_v9  ;;  %v501_v9 = vld [vmem:[%s1283_s2 + $0x8] sm:$0xff] (!%p698_p1) }
  0x3a   : > { %749 = vmatprep.subr.bf16.mxu0 %v924_v10  ;;  %833 = vmatprep.subr.bf16.mxu1 %v924_v10 }
  0x3d   : > { %750 = vmatpush3.bf16.msra.mxu0 %v924_v10  ;;  %841 = vmatpush3.bf16.msra.mxu1 %v924_v10  ;;  %v502_v10 = vld [vmem:[%s1283_s2 + $0x10] sm:$0xff] (!%p698_p1) }
  0x40   : > { %752 = vmatmul.mubr.bf16.vlgmr.msra.gmra.mrb[0].mxu0 %v926_v11  ;;  %760 = vmatmul.mubr.bf16.vlgmr.msra.gmra.mrb[0].mxu1 %v930_v12  ;;  %v1030_v11 = vmov (!%p698_p1), 0.0|0.0   ;;  %v803_v12 = vpack.c.bf16 (!%p698_p1), %v501_v9, %v500_v8 }
  0x41   : > { %755 = vmatprep.mubr.bf16.mxu0 %v927_v13  ;;  %763 = vmatprep.mubr.bf16.mxu1 %v931_v14  ;;  %v503_v13 = vld [vmem:[%s1283_s2 + $0x18] sm:$0xff] (!%p698_p1)  ;;  %v1032_v14 = vmov (!%p698_p1), 0.0  }
  0x42   : > { %802 = vmatprep.subr.bf16.mxu0 (!%p698_p1), %v1030_v11 }
  0x43   : > { %804 = vmatpush3.bf16.msra.mxu0 (!%p698_p1), %v803_v12 }
  0x44   : > { %805 = vmatprep.subr.bf16.mxu0 (!%p698_p1), %v1030_v11 }
  0x48   : > { %756 = vmatmul.mubr.bf16.gmra.mrb[4].mxu0 %v928_v15  ;;  %764 = vmatmul.mubr.bf16.gmra.mrb[4].mxu1 %v932_v16  ;;  %v806_v15 = vpack.c.bf16 (!%p698_p1), %v503_v13, %v502_v10  ;;  %v504_v16 = vld [vmem:[%s1283_s2 + $0x20] sm:$0xff] (!%p698_p1) }
  0x49   : > { %799 = vmatprep.mubr.msk.f32.mxu0 (!%p698_p1), %vm1031_vm0, %v1032_v14 }
  0x4a   : > { %807 = vmatpush3.bf16.msra.mxu0 (!%p698_p1), %v806_v15 }
  0x4b   : > { %808 = vmatprep.subr.bf16.mxu0 (!%p698_p1), %v1030_v11 }
 0x113   : > { %v753_v17 = vpop.f32.mrb[0].mxu0  ;;  %v761_v18 = vpop.f32.mrb[0].mxu1 }
 0x114   : > { %v391_v19 = vpop.f32.mrb[1].mxu0  ;;  %v423_v20 = vpop.f32.mrb[1].mxu1  ;;  %v456_v27 = vmax.f32 %v753_v17, 0.0  ;;  %v464_v51 = vmax.f32 %v761_v18, 0.0  ;;  %v505_v17 = vld [vmem:[%s1283_s2 + $0x28] sm:$0xff] (!%p698_p1) }
 0x115   : > { %v754_v21 = vpop.f32.mrb[2].mxu0  ;;  %v762_v22 = vpop.f32.mrb[2].mxu1  ;;  %v454_v25 = vmax.f32 %v391_v19, 0.0  ;;  %v462_v47 = vmax.f32 %v423_v20, 0.0  ;;  %v809_v18 = vpack.c.bf16 (!%p698_p1), %v505_v17, %v504_v16  ;;  %v506_v19 = vld [vmem:[%s1283_s2 + $0x30] sm:$0xff] (!%p698_p1)  ;;  %v507_v20 = vld [vmem:[%s1283_s2 + $0x38] sm:$0xff] (!%p698_p1) }
 0x116   : > { %v394_v23 = vpop.f32.mrb[3].mxu0  ;;  %v426_v24 = vpop.f32.mrb[3].mxu1  ;;  %v457_v29 = vmax.f32 %v754_v21, 0.0  ;;  %v465_v53 = vmax.f32 %v762_v22, 0.0  ;;  %v812_v21 = vpack.c.bf16 (!%p698_p1), %v507_v20, %v506_v19  ;;  %v508_v22 = vld [vmem:[%s1283_s2 + $0x40] sm:$0xff] (!%p698_p1) }
 0x117   : > { %v455_v26 = vmax.f32 %v394_v23, 0.0  ;;  %v463_v50 = vmax.f32 %v426_v24, 0.0  ;;  %810 = vmatpush3.bf16.msra.mxu0 (!%p698_p1), %v809_v18  ;;  %v509_v23 = vld [vmem:[%s1283_s2 + $0x48] sm:$0xff] (!%p698_p1) }
 0x118   : > { %811 = vmatprep.subr.bf16.mxu0 (!%p698_p1), %v1030_v11  ;;  %v815_v24 = vpack.c.bf16 (!%p698_p1), %v509_v23, %v508_v22 }
 0x119   : > { %v471_v28 = vadd.f32 %v455_v26, %v454_v25  ;;  %v510_v25 = vld [vmem:[%s1283_s2 + $0x50] sm:$0xff] (!%p698_p1)  ;;  %v511_v26 = vld [vmem:[%s1283_s2 + $0x58] sm:$0xff] (!%p698_p1) }
 0x11b   : > { %v472_v30 = vadd.f32 %v471_v28, %v456_v27  ;;  %v757_v31 = vpop.f32.mrb[4].mxu0  ;;  %v765_v32 = vpop.f32.mrb[4].mxu1  ;;  %813 = vmatpush3.bf16.msra.mxu0 (!%p698_p1), %v812_v21  ;;  %v818_v27 = vpack.c.bf16 (!%p698_p1), %v511_v26, %v510_v25  ;;  %v512_v28 = vld [vmem:[%s1283_s2 + $0x60] sm:$0xff] (!%p698_p1) }
 0x11c   : > { %v407_v33 = vpop.f32.mrb[5].mxu0  ;;  %v439_v34 = vpop.f32.mrb[5].mxu1  ;;  %v460_v43 = vmax.f32 %v757_v31, 0.0  ;;  %v468_v59 = vmax.f32 %v765_v32, 0.0  ;;  %814 = vmatprep.subr.bf16.mxu0 (!%p698_p1), %v1030_v11  ;;  %v514_v31 = vld [vmem:[%s1283_s2 + $0x70] sm:$0xff] (!%p698_p1)  ;;  %v515_v32 = vld [vmem:[%s1283_s2 + $0x78] sm:$0xff] (!%p698_p1) }
 0x11d   : > { %v458_v35 = vmax.f32 %v407_v33, 0.0  ;;  %v473_v36 = vadd.f32 %v472_v30, %v457_v29  ;;  %v758_v37 = vpop.f32.mrb[6].mxu0  ;;  %v766_v38 = vpop.f32.mrb[6].mxu1  ;;  %v466_v55 = vmax.f32 %v439_v34, 0.0  ;;  %v513_v29 = vld [vmem:[%s1283_s2 + $0x68] sm:$0xff] (!%p698_p1)  ;;  %v824_v33 = vpack.c.bf16 (!%p698_p1), %v515_v32, %v514_v31 }
 0x11e   : > { %v410_v39 = vpop.f32.mrb[7].mxu0  ;;  %v442_v40 = vpop.f32.mrb[7].mxu1  ;;  %v461_v45 = vmax.f32 %v758_v37, 0.0  ;;  %v469_v61 = vmax.f32 %v766_v38, 0.0  ;;  %v821_v30 = vpack.c.bf16 (!%p698_p1), %v513_v29, %v512_v28 }
 0x11f   : > { %v474_v41 = vadd.f32 %v473_v36, %v458_v35  ;;  %v459_v42 = vmax.f32 %v410_v39, 0.0  ;;  %v467_v58 = vmax.f32 %v442_v40, 0.0  ;;  %816 = vmatpush3.bf16.msra.mxu0 (!%p698_p1), %v815_v24  ;;  %v516_v36 = vld [vmem:[%s1284_s3] sm:$0x1] (!%p698_p1) }
 0x120   : > { %817 = vmatprep.subr.bf16.mxu0 (!%p698_p1), %v1030_v11 }
 0x121   : > { %v475_v44 = vadd.f32 %v474_v41, %v459_v42 }
 0x123   : > { %v476_v46 = vadd.f32 %v475_v44, %v460_v43  ;;  %819 = vmatpush3.bf16.msra.mxu0 (!%p698_p1), %v818_v27 }
 0x124   : > { %820 = vmatprep.subr.bf16.mxu0 (!%p698_p1), %v1030_v11 }
 0x125   : > { %v477_v48 = vadd.f32 %v476_v46, %v461_v45 }
 0x127   : > { %v478_v49 = vadd.f32 %v477_v48, %v462_v47  ;;  %822 = vmatpush3.bf16.msra.mxu0 (!%p698_p1), %v821_v30 }
 0x128   : > { %823 = vmatprep.subr.bf16.mxu0 (!%p698_p1), %v1030_v11 }
 0x129   : > { %v479_v52 = vadd.f32 %v478_v49, %v463_v50 }
 0x12b   : > { %v480_v54 = vadd.f32 %v479_v52, %v464_v51  ;;  %825 = vmatpush3.bf16.msra.mxu0 (!%p698_p1), %v824_v33 }
 0x12d   : > { %v481_v56 = vadd.f32 %v480_v54, %v465_v53 }
 0x12f   : > { %v482_v57 = vadd.f32 %v481_v56, %v466_v55 }
 0x131   : > { %v483_v60 = vadd.f32 %v482_v57, %v467_v58 }
 0x133   : > { %v484_v62 = vadd.f32 %v483_v60, %v468_v59 }
 0x135   : > { %v485_v63 = vadd.f32 %v484_v62, %v469_v61 }
 0x137   : > { %v486_v0 = vrot.slane %v485_v63, 4 }
 0x139   : > { %v487_v1 = vadd.f32 %v486_v0, %v485_v63 }
 0x13b   : > { %v488_v2 = vrot.slane %v487_v1, 2 }
 0x13d   : > { %v489_v3 = vadd.f32 %v488_v2, %v487_v1 }
 0x13f   : > { %v490_v4 = vrot.slane %v489_v3, 1  ;;  %497 = sbr.rel (%p698_p1) target bundleno = 550 (0x226), region = 44 }
 0x141   : > { %v491_v6 = vadd.f32 %v490_v4, %v489_v3 }
 0x143   : > { %v492_v7 = vadd.f32 %v491_v6, %v470_v5 }
 0x145   : > { %493 = vst [vmem:[#allocation2] sm:$0x1] %v492_v7 }
 0x14c   : > { %v498_v34 = vld [vmem:[#allocation2] sm:$0x1] }
 0x14d   : > { %v499_v35 = vmul.f32 0.00390625, %v498_v34 }
 0x14f   : > { %800 = vmatmul.mubr.f32.vlgmr.msra.gmra.mrb[0].mxu0 %v499_v35 }
 0x222   : > { %v583_v37 = vpop.f32.mrb[0].mxu0 }
 0x223   : > { %v584_v38 = vadd.f32 %v583_v37, %v516_v36  ;;  %v801_v39 = vpop.f32.mrb[1].mxu0 }
 0x225   : > { %587 = vst [vmem:[%s1139_s23] sm:$0x1] %v584_v38 }
 0x226 PF: > { %s699_s8 = sshll.u32 %s1015_s19, 4  ;;  %s601_s11 = sshll.u32 %s1139_s23, 4  ;;  %s602_s11 = int_to_ptr.vmem [resolvable:$true] %s601_s11 }
 0x227   : > { %s1231_s10 = scalar_lea.hbm %s1285_s4, %s699_s8  ;;  %s589_s12 = scalar_lea.sflag [#allocation4], %s211_s6 }
 0x228   : > { %s933_s13 = scalar_lea.vmem %s602_s11, 16  ;;  %s1033_s24 = smov [#allocation3]  }
 0x229   : > { %p934_p2 = scmp.ne.s32.totalorder %s602_s11, %s933_s13  ;;  %s937_s29 = sshll.u32 %s1033_s24, 4  ;;  %s938_s29 = int_to_ptr.vmem [resolvable:$false] %s937_s29 }
 0x22a   : > { %s939_s30 = scalar_lea.vmem %s938_s29, 32  ;;  %p940_p6 = scmp.lt.s32.totalorder %s602_s11, %s938_s29 }
 0x22b   : > { %p935_p4 = pnand %p934_p2, %p1108_p3  ;;  %p941_p7 = scmp.lt.s32.totalorder %s939_s30, %s933_s13 }
 0x22d   : > { %p936_p5 = pneg %p935_p4  ;;  %p942_p8 = por %p941_p7, %p940_p6 }
 0x22f   : > { %p943_p10 = pnand %p942_p8, %p936_p5 }
 0x231   : > { %946 = shalt.err (!%p943_p10)
}
 0x232   : > { %s947_s19 = scalar_lea.hbm %s1231_s10, 16  ;;  %s951_s18 = scalar_lea.hbm %s1285_s4, 32 }
 0x233   : > { %p948_p11 = scmp.ne.s32.totalorder %s1231_s10, %s947_s19  ;;  %p952_p0 = scmp.lt.u32.totalorder %s1231_s10, %s1285_s4 }
 0x234   : > { %p953_p1 = scmp.lt.u32.totalorder %s951_s18, %s947_s19  ;;  %p955_p4 = scmp.lt.u32.totalorder %s947_s19, %s1231_s10 }
 0x235   : > { %p949_p12 = pnand %p948_p11, %p1108_p3 }
 0x236   : > { %p954_p2 = por %p953_p1, %p952_p0 }
 0x237   : > { %p950_p13 = pneg %p949_p12 }
 0x238   : > { %p956_p5 = por %p955_p4, %p954_p2 }
 0x23a   : > { %p957_p6 = pnand %p956_p5, %p950_p13 }
 0x23c   : > { %960 = shalt.err (!%p957_p6)
}
 0x23d   : > { %842 = dma.vmem_to_hbm [thread:$0]  (%p1108_p3), %s602_s11, 16, %s1231_s10, %s589_s12  }
 0x23e PF: > { %p848_p7 = scmp.ge.s32.totalorder %s1027_s22, 2  ;;  %s613_s9 = sand.u32 1, %s999_s15  }
 0x23f   : > { %s614_s14 = scalar_lea.sflag [#allocation4], %s613_s9 }
 0x240   : > { %p845_p8 = pnand %p848_p7, %p1118_p9 }
 0x242   : > { %994 = dma.done.wait (!%p845_p8), %s614_s14, 16  }
 0x243   : > { %996 = vsyncadd (!%p845_p8), %s614_s14, 4294967280  ;;  %s17_s22 = sadd.s32 1, %s1027_s22   ;;  %s1288_s15 = smov %s1003_s16 }
 0x244   : > { %p14_p10 = scmp.ge.s32.totalorder %s17_s22, 6   ;;  %s1289_s16 = smov %s1007_s17 }
 0x245   : > { %s1290_s17 = smov %s1126_s5  ;;  %s1291_s18 = smov %s1019_s20 }
 0x246   : > { %s1292_s19 = smov %s1023_s21  ;;  %s1293_s20 = smov %s1296_s25 }
 0x247   : > { %s1294_s21 = smov %s1300_s26  ;;  %16 = sbr.rel (!%p14_p10) target bundleno = 5 (0x5), region = 79 }
 0x24e   :  { %618 = vsyncpa [#allocation4], 1 }
 0x24f   :  { %620 = vsyncpa [#allocation4 + $0x1], 1 }

</bundles_post_ra>
